<compile_context>
chip_gen: v7x
topology: tpu7x:2x2x1
jax: 0.10.0
libtpu: 0.0.40
codegen_flags: <defaults>
</compile_context>

<pallas_src>
import jax
import jax.numpy as jnp
from jax.experimental import pallas as pl
from jax.experimental.pallas import tpu as pltpu


def _uncertainty_loss_kernel(packed_ref, out_ref, prec_ref):
    """packed: (6,) f32 SMEM = [seg, bin, bbox, lv0, lv1, lv2].

    out:  (1,1) f32 VMEM — total weighted loss.
    prec: (1,3) f32 VMEM — exp(-log_vars), reused by the backward pass.
    """
    lane = jax.lax.broadcasted_iota(jnp.int32, (1, 3), 1)

    # Splat the SMEM scalars into two 3-lane vectors (pure VPU selects).
    losses = jnp.where(lane == 0, packed_ref[0],
                       jnp.where(lane == 1, packed_ref[1], packed_ref[2]))
    lv = jnp.where(lane == 0, packed_ref[3],
                   jnp.where(lane == 1, packed_ref[4], packed_ref[5]))

    prec = jnp.exp(-lv)                  # ONE EUP exp over 3 lanes
    terms = prec * losses + lv           # one VPU FMA: exp(-lv)*loss + lv

    prec_ref[...] = prec
    out_ref[...] = jnp.sum(terms, axis=-1, keepdims=True)  # tiny XLU lane-sum


def _forward(seg_loss, bin_loss, bbox_loss, log_vars):
    packed = jnp.concatenate([
        jnp.stack([jnp.asarray(seg_loss, jnp.float32).reshape(()),
                   jnp.asarray(bin_loss, jnp.float32).reshape(()),
                   jnp.asarray(bbox_loss, jnp.float32).reshape(())]),
        jnp.asarray(log_vars, jnp.float32).reshape(3),
    ])

    out, prec = pl.pallas_call(
        _uncertainty_loss_kernel,
        out_shape=(jax.ShapeDtypeStruct((1, 1), jnp.float32),
                   jax.ShapeDtypeStruct((1, 3), jnp.float32)),
        in_specs=[pl.BlockSpec(memory_space=pltpu.SMEM)],
        out_specs=(pl.BlockSpec(memory_space=pltpu.VMEM),
                   pl.BlockSpec(memory_space=pltpu.VMEM)),
        cost_estimate=pl.CostEstimate(flops=9, transcendentals=3,
                                      bytes_accessed=40),
    )(packed)
    return out[0, 0], prec.reshape(3)   # 0-d scalar (matches torch 0-d output)


# pallas_call is not differentiable by default; log_vars is a learnable
# parameter, so provide the analytic VJP (pure jnp on the backward path,
# reusing the prec = exp(-log_vars) computed by the forward kernel).
@jax.custom_vjp
def uncertainty_loss(seg_loss, bin_loss, bbox_loss, log_vars):
    total, _ = _forward(seg_loss, bin_loss, bbox_loss, log_vars)
    return total


def _uncertainty_loss_fwd(seg_loss, bin_loss, bbox_loss, log_vars):
    total, prec = _forward(seg_loss, bin_loss, bbox_loss, log_vars)
    return total, (seg_loss, bin_loss, bbox_loss, log_vars, prec)


def _uncertainty_loss_bwd(res, g):
    seg, binl, bbox, lv, prec = res
    g32 = jnp.asarray(g, jnp.float32)
    losses = jnp.stack([jnp.asarray(seg, jnp.float32).reshape(()),
                        jnp.asarray(binl, jnp.float32).reshape(()),
                        jnp.asarray(bbox, jnp.float32).reshape(())])
    d_losses = g32 * prec                       # dL/dloss_i    = exp(-lv_i)
    d_lv = g32 * (1.0 - prec * losses)          # dL/dlog_var_i = 1 - exp(-lv_i)*loss_i
    # Cast cotangents back to the primal dtypes/shapes (bf16-safe).
    d_seg = d_losses[0].reshape(jnp.shape(seg)).astype(jnp.result_type(seg))
    d_bin = d_losses[1].reshape(jnp.shape(binl)).astype(jnp.result_type(binl))
    d_bbox = d_losses[2].reshape(jnp.shape(bbox)).astype(jnp.result_type(bbox))
    d_lv = d_lv.reshape(jnp.shape(lv)).astype(jnp.result_type(lv))
    return d_seg, d_bin, d_bbox, d_lv


uncertainty_loss.defvjp(_uncertainty_loss_fwd, _uncertainty_loss_bwd)


def _reference(seg_loss, bin_loss, bbox_loss, log_vars):
    prec = jnp.exp(-log_vars)
    return (prec[0] * seg_loss + log_vars[0]
            + prec[1] * bin_loss + log_vars[1]
            + prec[2] * bbox_loss + log_vars[2])


if __name__ == "__main__":
    key = jax.random.PRNGKey(0)
    k1, k2, k3, k4 = jax.random.split(key, 4)

    # Three scalar task losses (the module's forward inputs).
    seg_loss = jax.random.uniform(k1, (), jnp.float32, minval=0.0, maxval=2.0)
    bin_loss = jax.random.uniform(k2, (), jnp.float32, minval=0.0, maxval=2.0)
    bbox_loss = jax.random.uniform(k3, (), jnp.float32, minval=0.0, maxval=2.0)

    # Parameter init matches nn.Parameter(torch.zeros(3)).
    log_vars_init = jnp.zeros((3,), jnp.float32)
    total = uncertainty_loss(seg_loss, bin_loss, bbox_loss, log_vars_init)
    total = jax.block_until_ready(total)
    ref = _reference(seg_loss, bin_loss, bbox_loss, log_vars_init)
    assert jnp.allclose(total, ref, rtol=1e-6, atol=1e-6), (total, ref)

    # Stronger check with non-trivial log_vars (exercises the exp path).
    log_vars = 0.5 * jax.random.normal(k4, (3,), jnp.float32)
    total2 = jax.block_until_ready(
        uncertainty_loss(seg_loss, bin_loss, bbox_loss, log_vars))
    ref2 = _reference(seg_loss, bin_loss, bbox_loss, log_vars)
    assert jnp.allclose(total2, ref2, rtol=1e-6, atol=1e-6), (total2, ref2)

    # Gradient wrt the learnable parameter (validates the custom_vjp + prec
    # residual from the kernel).
    g_kernel = jax.grad(
        lambda lv: uncertainty_loss(seg_loss, bin_loss, bbox_loss, lv))(log_vars)
    g_ref = jax.grad(
        lambda lv: _reference(seg_loss, bin_loss, bbox_loss, lv))(log_vars)
    assert jnp.allclose(g_kernel, g_ref, rtol=1e-6, atol=1e-6), (g_kernel, g_ref)

    # Gradient wrt the task losses, including a bf16 input (validates the
    # cotangent-dtype fix in the backward pass).
    g_losses = jax.grad(
        lambda s, b, x: uncertainty_loss(s, b, x, log_vars),
        argnums=(0, 1, 2))(seg_loss, bin_loss, bbox_loss)
    g_losses_ref = jax.grad(
        lambda s, b, x: _reference(s, b, x, log_vars),
        argnums=(0, 1, 2))(seg_loss, bin_loss, bbox_loss)
    for gk, gr in zip(g_losses, g_losses_ref):
        assert jnp.allclose(gk, gr, rtol=1e-6, atol=1e-6), (gk, gr)

    seg_bf16 = seg_loss.astype(jnp.bfloat16)
    g_bf16 = jax.grad(
        lambda s: uncertainty_loss(s, bin_loss, bbox_loss, log_vars))(seg_bf16)
    g_bf16 = jax.block_until_ready(g_bf16)
    assert g_bf16.dtype == jnp.bfloat16

    print("KERNEL_OK")
</pallas_src>

<mosaic_0001>
module attributes {stable_mosaic.version = 11 : i64} {
  func.func @_uncertainty_loss_kernel(%arg0: memref<6xf32, #tpu.memory_space<smem>>, %arg1: memref<1x1xf32, #tpu.memory_space<vmem>>, %arg2: memref<1x3xf32, #tpu.memory_space<vmem>>) attributes {dimension_semantics = [], scalar_prefetch = 0 : i64, scratch_operands = 0 : i64, tpu.core_type = #tpu.core_type<tc>} {
    %0 = tpu.iota {dimensions = array<i32: 1>} : vector<1x3xi32>
    %c0_i32 = arith.constant 0 : i32
    %1 = vector.broadcast %c0_i32 : i32 to vector<1x3xi32>
    %2 = arith.cmpi eq, %0, %1 : vector<1x3xi32>
    %c0 = arith.constant 0 : index
    %3 = memref.load %arg0[%c0] : memref<6xf32, #tpu.memory_space<smem>>
    %c1_i32 = arith.constant 1 : i32
    %4 = vector.broadcast %c1_i32 : i32 to vector<1x3xi32>
    %5 = arith.cmpi eq, %0, %4 : vector<1x3xi32>
    %c1 = arith.constant 1 : index
    %6 = memref.load %arg0[%c1] : memref<6xf32, #tpu.memory_space<smem>>
    %c2 = arith.constant 2 : index
    %7 = memref.load %arg0[%c2] : memref<6xf32, #tpu.memory_space<smem>>
    %8 = vector.broadcast %6 : f32 to vector<1x3xf32>
    %9 = vector.broadcast %7 : f32 to vector<1x3xf32>
    %10 = arith.select %5, %8, %9 : vector<1x3xi1>, vector<1x3xf32>
    %11 = vector.broadcast %3 : f32 to vector<1x3xf32>
    %12 = arith.select %2, %11, %10 : vector<1x3xi1>, vector<1x3xf32>
    %c0_i32_0 = arith.constant 0 : i32
    %13 = vector.broadcast %c0_i32_0 : i32 to vector<1x3xi32>
    %14 = arith.cmpi eq, %0, %13 : vector<1x3xi32>
    %c3 = arith.constant 3 : index
    %15 = memref.load %arg0[%c3] : memref<6xf32, #tpu.memory_space<smem>>
    %c1_i32_1 = arith.constant 1 : i32
    %16 = vector.broadcast %c1_i32_1 : i32 to vector<1x3xi32>
    %17 = arith.cmpi eq, %0, %16 : vector<1x3xi32>
    %c4 = arith.constant 4 : index
    %18 = memref.load %arg0[%c4] : memref<6xf32, #tpu.memory_space<smem>>
    %c5 = arith.constant 5 : index
    %19 = memref.load %arg0[%c5] : memref<6xf32, #tpu.memory_space<smem>>
    %20 = vector.broadcast %18 : f32 to vector<1x3xf32>
    %21 = vector.broadcast %19 : f32 to vector<1x3xf32>
    %22 = arith.select %17, %20, %21 : vector<1x3xi1>, vector<1x3xf32>
    %23 = vector.broadcast %15 : f32 to vector<1x3xf32>
    %24 = arith.select %14, %23, %22 : vector<1x3xi1>, vector<1x3xf32>
    %cst = arith.constant 0.000000e+00 : f32
    %25 = vector.broadcast %cst : f32 to vector<1x3xf32>
    %26 = arith.subf %25, %24 : vector<1x3xf32>
    %27 = math.exp %26 : vector<1x3xf32>
    %28 = arith.mulf %27, %12 : vector<1x3xf32>
    %29 = arith.addf %28, %24 : vector<1x3xf32>
    %c0_2 = arith.constant 0 : index
    %c0_3 = arith.constant 0 : index
    %30 = vector.load %arg2[%c0_2, %c0_3] : memref<1x3xf32, #tpu.memory_space<vmem>>, vector<1x3xf32>
    tpu.vector_store %arg2[%c0_2, %c0_3], %27 {strides = array<i32>} : memref<1x3xf32, #tpu.memory_space<vmem>>, vector<1x3xf32>,
    %cst_4 = arith.constant dense<0.000000e+00> : vector<1xf32>
    %31 = vector.multi_reduction <add>, %29, %cst_4 [1] : vector<1x3xf32> to vector<1xf32>
    %32 = vector.shape_cast %31 : vector<1xf32> to vector<1x1xf32>
    %c0_5 = arith.constant 0 : index
    %c0_6 = arith.constant 0 : index
    %33 = vector.load %arg1[%c0_5, %c0_6] : memref<1x1xf32, #tpu.memory_space<vmem>>, vector<1x1xf32>
    tpu.vector_store %arg1[%c0_5, %c0_6], %32 {strides = array<i32>} : memref<1x1xf32, #tpu.memory_space<vmem>>, vector<1x1xf32>,
    return
  }
}

</mosaic_0001>

<bundles_post_ra>
// kernel: tpu_custom_call.1
= control target key start
LH: loop header
LB: loop body
LE: loop exit
PB: predicated region body
PF: predicated region fallthrough
CT: control target
= control target key end

     0   :  { %8 = vsyncpa [#allocation4], 0  ;;  %s211_s0 = inlined_call_operand.hbm [shape: f32[6], index: 0, kind: input, shape index: {}]   ;;  %s212_s1 = inlined_call_operand.hbm [shape: f32[1,1], index: 1, kind: output, shape index: {0}]   ;;  %s213_s2 = inlined_call_operand.hbm [shape: f32[1,3], index: 2, kind: output, shape index: {1}]  }
   0x1   :  { %9 = vsyncpa [#allocation3], 0 }
   0x2   :  { %10 = vsyncpa [#allocation7], 0  ;;  %s95_s11 = scalar_lea.hbm %s211_s0, 16 }
   0x3   :  { %p96_p0 = scmp.ne.s32.totalorder %s211_s0, %s95_s11  ;;  %p99_p1 = scmp.lt.u32.totalorder %s95_s11, %s211_s0 }
   0x5   :  { %p101_p2 = pnand %p99_p1, %p96_p0 }
   0x7   :  { %104 = shalt.err (!%p101_p2)
}
   0x8   :  { %s155_s16 = smov [#allocation2]  }
   0x9   :  { %18 = dma.hbm_to_smem %s211_s0, 16, %s155_s16, [#allocation4]  }
   0xa   :  { %149 = dma.done.wait [#allocation4], 16  }
   0xb   :  { %150 = vsyncadd [#allocation4], 4294967280 }
   0xc   :  { %22 = sfence }
   0xd   :  { %v23_v0 = vlaneseq  ;;  %s87_s19 = sld [smem:[#allocation2 + $0x3]]  ;;  %s88_s20 = sld [smem:[#allocation2 + $0x4]]  ;;  %vm50_vm2 = vcmask 23552   ;;  %vm48_vm3 = vcmask 16384  }
   0xe   :  { %s89_s21 = sld [smem:[#allocation2 + $0x5]]  ;;  %s85_s22 = sld [smem:[#allocation2 + $0x1]] }
   0xf   :  { %v24_v1 = vand.u32 127, %v23_v0  ;;  %s86_s23 = sld [smem:[#allocation2 + $0x2]]  ;;  %s26_s0 = sld [smem:[#allocation2]] }
  0x10   :  { %s156_s24 = smov [#allocation6]  }
  0x11   :  { %vm27_vm0 = vcmp.eq.s32.totalorder %v24_v1, 1  ;;  %vm25_vm1 = vcmp.eq.s32.totalorder %v24_v1, 0  ;;  %s72_s25 = sshll.u32 %s156_s24, 4  ;;  %s73_s25 = int_to_ptr.vmem [resolvable:$true] %s72_s25 }
  0x12   :  { %s105_s26 = scalar_lea.vmem %s73_s25, 16  ;;  %s109_s27 = scalar_lea.vmem %s73_s25, 32 }
  0x13   :  { %v41_v2 = vstv %s87_s19  ;;  %v38_v3 = vstv %s88_s20  ;;  %p106_p3 = scmp.ne.s32.totalorder %s73_s25, %s105_s26  ;;  %p110_p4 = scmp.lt.s32.totalorder %s73_s25, %s73_s25 }
  0x14   :  { %v39_v4 = vstv %s89_s21  ;;  %v30_v9 = vstv %s85_s22  ;;  %p111_p5 = scmp.lt.s32.totalorder %s109_s27, %s105_s26 }
  0x15   :  { %v40_v5 = vsel %vm27_vm0, %v38_v3, %v39_v4  ;;  %v31_v10 = vstv %s86_s23  ;;  %v33_v12 = vstv %s26_s0 }
  0x16   :  { %v42_v6 = vsel %vm25_vm1, %v41_v2, %v40_v5  ;;  %v32_v11 = vsel %vm27_vm0, %v30_v9, %v31_v10  ;;  %p112_p6 = por %p111_p5, %p110_p4 }
  0x17   :  { %v43_v7 = vsub.f32 0.0, %v42_v6  ;;  %v34_v13 = vsel %vm25_vm1, %v33_v12, %v32_v11 }
  0x18   :  { %p113_p7 = pnand %p112_p6, %p106_p3 }
  0x19   :  { %v44_v8 = vmul.f32 1.442695, %v43_v7 }
  0x1b   :  { %93 = vpow2.f32 %v44_v8 }
  0x25   :  { %v94_v14 = vpop.eup %93 }
  0x26   :  { %v46_v15 = vmul.f32 %v94_v14, %v34_v13  ;;  %49 = vst.msk [vmem:[#allocation6] sm:$0x1] %vm48_vm3, %v94_v14 }
  0x28   :  { %v47_v16 = vadd.f32 %v46_v15, %v42_v6 }
  0x2a   :  { %v51_v17 = vsel %vm50_vm2, %v47_v16, 0.0 }
  0x2b   :  { %52 = vadd.xlane.f32.xlu0 %v51_v17 }
  0x2c   :  { %116 = shalt.err (!%p113_p7)
}
  0x2d   :  { %s117_s30 = scalar_lea.hbm %s213_s2, 16 }
  0x2e   :  { %p118_p8 = scmp.ne.s32.totalorder %s213_s2, %s117_s30  ;;  %p121_p9 = scmp.lt.u32.totalorder %s117_s30, %s213_s2 }
  0x30   :  { %p123_p10 = pnand %p121_p9, %p118_p8 }
  0x32   :  { %126 = shalt.err (!%p123_p10)
}
  0x33   :  { %75 = dma.vmem_to_hbm [thread:$0]  %s73_s25, 16, %s213_s2, [#allocation7]   ;;  %vm54_vm4 = vcmask 0  }
  0x34   :  { %s157_s9 = smov [#allocation5]  }
  0x35   :  { %s62_s10 = sshll.u32 %s157_s9, 4  ;;  %s63_s10 = int_to_ptr.vmem [resolvable:$true] %s62_s10 }
  0x36   :  { %s127_s11 = scalar_lea.vmem %s63_s10, 16  ;;  %s131_s12 = scalar_lea.vmem %s63_s10, 32 }
  0x37   :  { %p128_p11 = scmp.ne.s32.totalorder %s63_s10, %s127_s11  ;;  %p132_p12 = scmp.lt.s32.totalorder %s63_s10, %s63_s10 }
  0x38   :  { %p133_p13 = scmp.lt.s32.totalorder %s131_s12, %s127_s11 }
  0x3a   :  { %p134_p0 = por %p133_p13, %p132_p12 }
  0x3c   :  { %p135_p1 = pnand %p134_p0, %p128_p11 }
  0xb8   :  { %v53_v18 = vpop.xlane.xlu0 %52 }
  0xb9   :  { %55 = vst.msk [vmem:[#allocation5] sm:$0x1] %vm54_vm4, %v53_v18 }
  0xba   :  { %138 = shalt.err (!%p135_p1)
}
  0xbb   :  { %s139_s15 = scalar_lea.hbm %s212_s1, 16 }
  0xbc   :  { %p140_p2 = scmp.ne.s32.totalorder %s212_s1, %s139_s15  ;;  %p143_p3 = scmp.lt.u32.totalorder %s139_s15, %s212_s1 }
  0xbe   :  { %p145_p4 = pnand %p143_p3, %p140_p2 }
  0xc0   :  { %148 = shalt.err (!%p145_p4)
}
  0xc1   :  { %65 = dma.vmem_to_hbm [thread:$0]  %s63_s10, 16, %s212_s1, [#allocation3]  }
  0xc2   :  { %151 = dma.done.wait [#allocation3], 16  }
  0xc3   :  { %152 = vsyncadd [#allocation3], 4294967280 }
  0xc4   :  { %153 = dma.done.wait [#allocation7], 16  }
  0xc5   :  { %154 = vsyncadd [#allocation7], 4294967280 }
  0xc6   :  { %82 = vsyncpa [#allocation3], 1 }
  0xc7   :  { %83 = vsyncpa [#allocation7], 1 }
  0xc8   :  { %84 = vsyncpa [#allocation4], 1 }

</bundles_post_ra>
